<compile_context>
chip_gen: v7x
topology: tpu7x:2x2x1
jax: 0.10.0
libtpu: 0.0.40
codegen_flags: <defaults>
</compile_context>

<pallas_src>
import functools

import jax
import jax.numpy as jnp
from jax.experimental import pallas as pl
from jax.experimental.pallas import tpu as pltpu


def rnn_kernel(
    x_ref,       # (S*B, D)   f32  input sequence, time-major rows
    wih0_ref,    # (D, H)     bf16 layer-0 input->hidden (transposed)
    b0_ref,      # (1, H)     f32  layer-0 combined bias (b_ih0 + b_hh0)
    whh0_ref,    # (H, H)     bf16 layer-0 hidden->hidden (transposed)
    wih1_ref,    # (H, H)     bf16 layer-1 input->hidden (transposed)
    whh1_ref,    # (H, H)     bf16 layer-1 hidden->hidden (transposed)
    b1_ref,      # (1, H)     f32  layer-1 combined bias (b_ih1 + b_hh1)
    wd_ref,      # (H, OP)    bf16 folded decoder weight, zero-padded to OP lanes
    bd_ref,      # (1, OP)    f32  folded decoder bias, zero-padded
    out_ref,     # (S*B, OP)  f32
    *,
    seq_len,
    batch,
):
    S, B = seq_len, batch
    H = whh0_ref.shape[0]

    # --- Non-recurrent: layer-0 input projection batched over all timesteps.
    xw = (
        jnp.dot(x_ref[...].astype(jnp.bfloat16), wih0_ref[...],
                preferred_element_type=jnp.float32)
        + b0_ref[...]
    )                                                       # (S*B, H) f32

    # Hoist weight loads out of the unrolled loop.
    whh0 = whh0_ref[...]
    wih1 = wih1_ref[...]
    whh1 = whh1_ref[...]
    b1 = b1_ref[...]

    h0_prev = jnp.zeros((B, H), jnp.bfloat16)   # h0_{t-1}
    h1_prev = jnp.zeros((B, H), jnp.bfloat16)   # h1_{t-2}
    h1_steps = []

    # --- Skewed recurrence: iteration t runs layer-0 step t and layer-1 step
    #     t-1.  h0_new depends only on h0_prev; h1 depends on h0_prev and
    #     h1_prev — independent of h0_new, so the two chains overlap.
    for t in range(S + 1):
        h0_new = None
        if t < S:
            acc0 = xw[t * B:(t + 1) * B, :]                  # static slice
            if t > 0:                                        # skip 0 @ W_hh0 at t=0
                acc0 = acc0 + jnp.dot(h0_prev, whh0,
                                      preferred_element_type=jnp.float32)
            h0_new = jnp.tanh(acc0).astype(jnp.bfloat16)
        if t > 0:
            # layer-1 step (t-1): uses h0_{t-1} (= h0_prev) and h1_{t-2}.
            acc1 = jnp.dot(h0_prev, wih1,
                           preferred_element_type=jnp.float32) + b1
            if t > 1:                                        # skip 0 @ W_hh1 at t=1
                acc1 = acc1 + jnp.dot(h1_prev, whh1,
                                      preferred_element_type=jnp.float32)
            h1_f32 = jnp.tanh(acc1)
            h1_steps.append(h1_f32)
            h1_prev = h1_f32.astype(jnp.bfloat16)
        if t < S:
            h0_prev = h0_new

    h1_all = jnp.concatenate(h1_steps, axis=0).astype(jnp.bfloat16)  # (S*B, H)

    # --- Folded decoder, lane-dense padded, one matmul + one dense store.
    dec = (
        jnp.dot(h1_all, wd_ref[...], preferred_element_type=jnp.float32)
        + bd_ref[...]
    )
    out_ref[...] = dec.astype(out_ref.dtype)


@jax.jit
def rnn_forward(x, params):
    """x: (seq_len, batch, input_dim) float32. Returns squeeze(out, axis=1)."""
    S, B, D = x.shape
    H = params["whh0"].shape[0]
    O = params["wd3"].shape[1]
    OP = max(128, ((O + 127) // 128) * 128)      # lane-dense decoder width

    # Exact fold of the 3 purely-linear decoder layers into one affine map.
    wd = params["wd1"] @ params["wd2"] @ params["wd3"]                       # (H, O)
    bd = (params["bd1"] @ params["wd2"] + params["bd2"]) @ params["wd3"] + params["bd3"]
    wd_pad = jnp.zeros((H, OP), jnp.float32).at[:, :O].set(wd)
    bd_pad = jnp.zeros((1, OP), jnp.float32).at[:, :O].set(bd)

    bf = lambda a: a.astype(jnp.bfloat16)
    full = lambda shape: pl.BlockSpec(shape, lambda i, s=shape: (0,) * len(s))

    out2d = pl.pallas_call(
        functools.partial(rnn_kernel, seq_len=S, batch=B),
        out_shape=jax.ShapeDtypeStruct((S * B, OP), jnp.float32),
        grid_spec=pltpu.PrefetchScalarGridSpec(
            num_scalar_prefetch=0,
            grid=(1,),
            in_specs=[
                full((S * B, D)),                                  # x
                full((D, H)), full((1, H)), full((H, H)),          # layer 0
                full((H, H)), full((H, H)), full((1, H)),          # layer 1
                full((H, OP)), full((1, OP)),                      # folded decoder
            ],
            out_specs=full((S * B, OP)),
        ),
        compiler_params=pltpu.CompilerParams(
            dimension_semantics=("arbitrary",),
        ),
    )(
        x.reshape(S * B, D),
        bf(params["wih0"]), params["b0"], bf(params["whh0"]),
        bf(params["wih1"]), bf(params["whh1"]), params["b1"],
        bf(wd_pad), bd_pad,
    )

    out = out2d[:, :O].reshape(S, B, O)
    # torch.squeeze(x4, 1): drop batch axis only when it is size 1.
    return out[:, 0, :] if B == 1 else out


def init_params(key, input_dim, output_dim, hidden_dim=128):
    ks = jax.random.split(key, 16)
    u = lambda k, shape, fan: jax.random.uniform(
        k, shape, jnp.float32, -1.0 / jnp.sqrt(fan), 1.0 / jnp.sqrt(fan)
    )
    H = hidden_dim
    return {
        # RNN layer 0 (weights stored transposed: (in, out))
        "wih0": u(ks[0], (input_dim, H), H),
        "whh0": u(ks[1], (H, H), H),
        "b0":   u(ks[2], (1, H), H) + u(ks[3], (1, H), H),   # b_ih0 + b_hh0
        # RNN layer 1
        "wih1": u(ks[4], (H, H), H),
        "whh1": u(ks[5], (H, H), H),
        "b1":   u(ks[6], (1, H), H) + u(ks[7], (1, H), H),   # b_ih1 + b_hh1
        # decoder1/2/3 (Linear, transposed)
        "wd1": u(ks[8], (H, 64), H),    "bd1": u(ks[9], (1, 64), H),
        "wd2": u(ks[10], (64, 32), 64), "bd2": u(ks[11], (1, 32), 64),
        "wd3": u(ks[12], (32, output_dim), 32),
        "bd3": u(ks[13], (1, output_dim), 32),
    }


if __name__ == "__main__":
    seq_len, batch, input_dim, output_dim, hidden_dim = 8, 1, 16, 2, 128

    key = jax.random.PRNGKey(0)
    kx, kp = jax.random.split(key)
    x = jax.random.normal(kx, (seq_len, batch, input_dim), dtype=jnp.float32)
    params = init_params(kp, input_dim, output_dim, hidden_dim)

    y = rnn_forward(x, params)
    jax.block_until_ready(y)
    assert y.shape == (seq_len, output_dim), y.shape

    # pure-JAX f32 reference of the original (unfolded) recurrence + decoders
    def ref(x, p):
        h0 = jnp.zeros((batch, hidden_dim), jnp.float32)
        h1 = jnp.zeros((batch, hidden_dim), jnp.float32)
        outs = []
        for t in range(seq_len):
            h0 = jnp.tanh(x[t] @ p["wih0"] + h0 @ p["whh0"] + p["b0"])
            h1 = jnp.tanh(h0 @ p["wih1"] + h1 @ p["whh1"] + p["b1"])
            d = ((h1 @ p["wd1"] + p["bd1"]) @ p["wd2"] + p["bd2"]) @ p["wd3"] + p["bd3"]
            outs.append(d)
        return jnp.stack(outs)[:, 0, :]

    # bf16 matmul operands (f32 accumulation) -> loosened tolerance vs f32 ref.
    assert jnp.allclose(y, ref(x, params), atol=5e-2), "mismatch vs reference"
    # TODO(synk): training loop / CrossEntropyLoss / Adam from the original
    # module are out of scope for a forward-pass kernel.
    print("KERNEL_OK")
</pallas_src>

<mosaic_0001>
module attributes {stable_mosaic.version = 11 : i64} {
  func.func @rnn_kernel(%arg0: i32, %arg1: memref<8x16xf32, #tpu.memory_space<vmem>>, %arg2: memref<16x128xbf16, #tpu.memory_space<vmem>>, %arg3: memref<1x128xf32, #tpu.memory_space<vmem>>, %arg4: memref<128x128xbf16, #tpu.memory_space<vmem>>, %arg5: memref<128x128xbf16, #tpu.memory_space<vmem>>, %arg6: memref<128x128xbf16, #tpu.memory_space<vmem>>, %arg7: memref<1x128xf32, #tpu.memory_space<vmem>>, %arg8: memref<128x128xbf16, #tpu.memory_space<vmem>>, %arg9: memref<1x128xf32, #tpu.memory_space<vmem>>, %arg10: memref<8x128xf32, #tpu.memory_space<vmem>>) attributes {dimension_semantics = [#tpu.dimension_semantics<arbitrary>], iteration_bounds = array<i64: 1>, scalar_prefetch = 0 : i64, scratch_operands = 0 : i64, tpu.core_type = #tpu.core_type<tc>, window_params = [{pipeline_mode = #tpu.pipeline_mode<synchronous>, transform_indices = @transform_0, window_bounds = array<i64: 8, 16>}, {pipeline_mode = #tpu.pipeline_mode<synchronous>, transform_indices = @transform_1, window_bounds = array<i64: 16, 128>}, {pipeline_mode = #tpu.pipeline_mode<synchronous>, transform_indices = @transform_2, window_bounds = array<i64: 1, 128>}, {pipeline_mode = #tpu.pipeline_mode<synchronous>, transform_indices = @transform_3, window_bounds = array<i64: 128, 128>}, {pipeline_mode = #tpu.pipeline_mode<synchronous>, transform_indices = @transform_4, window_bounds = array<i64: 128, 128>}, {pipeline_mode = #tpu.pipeline_mode<synchronous>, transform_indices = @transform_5, window_bounds = array<i64: 128, 128>}, {pipeline_mode = #tpu.pipeline_mode<synchronous>, transform_indices = @transform_6, window_bounds = array<i64: 1, 128>}, {pipeline_mode = #tpu.pipeline_mode<synchronous>, transform_indices = @transform_7, window_bounds = array<i64: 128, 128>}, {pipeline_mode = #tpu.pipeline_mode<synchronous>, transform_indices = @transform_8, window_bounds = array<i64: 1, 128>}, {pipeline_mode = #tpu.pipeline_mode<synchronous>, transform_indices = @transform_9, window_bounds = array<i64: 8, 128>}]} {
    %c0 = arith.constant 0 : index
    %c0_0 = arith.constant 0 : index
    %0 = vector.load %arg1[%c0, %c0_0] : memref<8x16xf32, #tpu.memory_space<vmem>>, vector<8x16xf32>
    %1 = arith.truncf %0 : vector<8x16xf32> to vector<8x16xbf16>
    %c0_1 = arith.constant 0 : index
    %c0_2 = arith.constant 0 : index
    %2 = vector.load %arg2[%c0_1, %c0_2] : memref<16x128xbf16, #tpu.memory_space<vmem>>, vector<16x128xbf16>
    %cst = arith.constant dense<0.000000e+00> : vector<8x128xf32>
    %3 = tpu.matmul %1, %2, %cst {dimension_numbers = #tpu.dot_dimension_numbers<[1], [0], [0], [1], [0, 0, 1, 1], [], []>} : vector<8x16xbf16>, vector<16x128xbf16>, vector<8x128xf32> -> vector<8x128xf32>
    %c0_3 = arith.constant 0 : index
    %c0_4 = arith.constant 0 : index
    %4 = vector.load %arg3[%c0_3, %c0_4] : memref<1x128xf32, #tpu.memory_space<vmem>>, vector<1x128xf32>
    %5 = vector.broadcast %4 : vector<1x128xf32> to vector<8x128xf32>
    %6 = arith.addf %3, %5 : vector<8x128xf32>
    %c0_5 = arith.constant 0 : index
    %c0_6 = arith.constant 0 : index
    %7 = vector.load %arg4[%c0_5, %c0_6] : memref<128x128xbf16, #tpu.memory_space<vmem>>, vector<128x128xbf16>
    %c0_7 = arith.constant 0 : index
    %c0_8 = arith.constant 0 : index
    %8 = vector.load %arg5[%c0_7, %c0_8] : memref<128x128xbf16, #tpu.memory_space<vmem>>, vector<128x128xbf16>
    %c0_9 = arith.constant 0 : index
    %c0_10 = arith.constant 0 : index
    %9 = vector.load %arg6[%c0_9, %c0_10] : memref<128x128xbf16, #tpu.memory_space<vmem>>, vector<128x128xbf16>
    %c0_11 = arith.constant 0 : index
    %c0_12 = arith.constant 0 : index
    %10 = vector.load %arg7[%c0_11, %c0_12] : memref<1x128xf32, #tpu.memory_space<vmem>>, vector<1x128xf32>
    %11 = vector.extract_strided_slice %6 {offsets = [0, 0], sizes = [1, 128], strides = [1, 1]} : vector<8x128xf32> to vector<1x128xf32>
    %12 = math.tanh %11 : vector<1x128xf32>
    %13 = arith.truncf %12 : vector<1x128xf32> to vector<1x128xbf16>
    %14 = vector.extract_strided_slice %6 {offsets = [1, 0], sizes = [1, 128], strides = [1, 1]} : vector<8x128xf32> to vector<1x128xf32>
    %cst_13 = arith.constant dense<0.000000e+00> : vector<1x128xf32>
    %15 = tpu.matmul %13, %7, %cst_13 {dimension_numbers = #tpu.dot_dimension_numbers<[1], [0], [0], [1], [0, 0, 1, 1], [], []>} : vector<1x128xbf16>, vector<128x128xbf16>, vector<1x128xf32> -> vector<1x128xf32>
    %16 = arith.addf %14, %15 : vector<1x128xf32>
    %17 = math.tanh %16 : vector<1x128xf32>
    %18 = arith.truncf %17 : vector<1x128xf32> to vector<1x128xbf16>
    %cst_14 = arith.constant dense<0.000000e+00> : vector<1x128xf32>
    %19 = tpu.matmul %13, %8, %cst_14 {dimension_numbers = #tpu.dot_dimension_numbers<[1], [0], [0], [1], [0, 0, 1, 1], [], []>} : vector<1x128xbf16>, vector<128x128xbf16>, vector<1x128xf32> -> vector<1x128xf32>
    %20 = arith.addf %19, %10 : vector<1x128xf32>
    %21 = math.tanh %20 : vector<1x128xf32>
    %22 = arith.truncf %21 : vector<1x128xf32> to vector<1x128xbf16>
    %23 = vector.extract_strided_slice %6 {offsets = [2, 0], sizes = [1, 128], strides = [1, 1]} : vector<8x128xf32> to vector<1x128xf32>
    %cst_15 = arith.constant dense<0.000000e+00> : vector<1x128xf32>
    %24 = tpu.matmul %18, %7, %cst_15 {dimension_numbers = #tpu.dot_dimension_numbers<[1], [0], [0], [1], [0, 0, 1, 1], [], []>} : vector<1x128xbf16>, vector<128x128xbf16>, vector<1x128xf32> -> vector<1x128xf32>
    %25 = arith.addf %23, %24 : vector<1x128xf32>
    %26 = math.tanh %25 : vector<1x128xf32>
    %27 = arith.truncf %26 : vector<1x128xf32> to vector<1x128xbf16>
    %cst_16 = arith.constant dense<0.000000e+00> : vector<1x128xf32>
    %28 = tpu.matmul %18, %8, %cst_16 {dimension_numbers = #tpu.dot_dimension_numbers<[1], [0], [0], [1], [0, 0, 1, 1], [], []>} : vector<1x128xbf16>, vector<128x128xbf16>, vector<1x128xf32> -> vector<1x128xf32>
    %29 = arith.addf %28, %10 : vector<1x128xf32>
    %cst_17 = arith.constant dense<0.000000e+00> : vector<1x128xf32>
    %30 = tpu.matmul %22, %9, %cst_17 {dimension_numbers = #tpu.dot_dimension_numbers<[1], [0], [0], [1], [0, 0, 1, 1], [], []>} : vector<1x128xbf16>, vector<128x128xbf16>, vector<1x128xf32> -> vector<1x128xf32>
    %31 = arith.addf %29, %30 : vector<1x128xf32>
    %32 = math.tanh %31 : vector<1x128xf32>
    %33 = arith.truncf %32 : vector<1x128xf32> to vector<1x128xbf16>
    %34 = vector.extract_strided_slice %6 {offsets = [3, 0], sizes = [1, 128], strides = [1, 1]} : vector<8x128xf32> to vector<1x128xf32>
    %cst_18 = arith.constant dense<0.000000e+00> : vector<1x128xf32>
    %35 = tpu.matmul %27, %7, %cst_18 {dimension_numbers = #tpu.dot_dimension_numbers<[1], [0], [0], [1], [0, 0, 1, 1], [], []>} : vector<1x128xbf16>, vector<128x128xbf16>, vector<1x128xf32> -> vector<1x128xf32>
    %36 = arith.addf %34, %35 : vector<1x128xf32>
    %37 = math.tanh %36 : vector<1x128xf32>
    %38 = arith.truncf %37 : vector<1x128xf32> to vector<1x128xbf16>
    %cst_19 = arith.constant dense<0.000000e+00> : vector<1x128xf32>
    %39 = tpu.matmul %27, %8, %cst_19 {dimension_numbers = #tpu.dot_dimension_numbers<[1], [0], [0], [1], [0, 0, 1, 1], [], []>} : vector<1x128xbf16>, vector<128x128xbf16>, vector<1x128xf32> -> vector<1x128xf32>
    %40 = arith.addf %39, %10 : vector<1x128xf32>
    %cst_20 = arith.constant dense<0.000000e+00> : vector<1x128xf32>
    %41 = tpu.matmul %33, %9, %cst_20 {dimension_numbers = #tpu.dot_dimension_numbers<[1], [0], [0], [1], [0, 0, 1, 1], [], []>} : vector<1x128xbf16>, vector<128x128xbf16>, vector<1x128xf32> -> vector<1x128xf32>
    %42 = arith.addf %40, %41 : vector<1x128xf32>
    %43 = math.tanh %42 : vector<1x128xf32>
    %44 = arith.truncf %43 : vector<1x128xf32> to vector<1x128xbf16>
    %45 = vector.extract_strided_slice %6 {offsets = [4, 0], sizes = [1, 128], strides = [1, 1]} : vector<8x128xf32> to vector<1x128xf32>
    %cst_21 = arith.constant dense<0.000000e+00> : vector<1x128xf32>
    %46 = tpu.matmul %38, %7, %cst_21 {dimension_numbers = #tpu.dot_dimension_numbers<[1], [0], [0], [1], [0, 0, 1, 1], [], []>} : vector<1x128xbf16>, vector<128x128xbf16>, vector<1x128xf32> -> vector<1x128xf32>
    %47 = arith.addf %45, %46 : vector<1x128xf32>
    %48 = math.tanh %47 : vector<1x128xf32>
    %49 = arith.truncf %48 : vector<1x128xf32> to vector<1x128xbf16>
    %cst_22 = arith.constant dense<0.000000e+00> : vector<1x128xf32>
    %50 = tpu.matmul %38, %8, %cst_22 {dimension_numbers = #tpu.dot_dimension_numbers<[1], [0], [0], [1], [0, 0, 1, 1], [], []>} : vector<1x128xbf16>, vector<128x128xbf16>, vector<1x128xf32> -> vector<1x128xf32>
    %51 = arith.addf %50, %10 : vector<1x128xf32>
    %cst_23 = arith.constant dense<0.000000e+00> : vector<1x128xf32>
    %52 = tpu.matmul %44, %9, %cst_23 {dimension_numbers = #tpu.dot_dimension_numbers<[1], [0], [0], [1], [0, 0, 1, 1], [], []>} : vector<1x128xbf16>, vector<128x128xbf16>, vector<1x128xf32> -> vector<1x128xf32>
    %53 = arith.addf %51, %52 : vector<1x128xf32>
    %54 = math.tanh %53 : vector<1x128xf32>
    %55 = arith.truncf %54 : vector<1x128xf32> to vector<1x128xbf16>
    %56 = vector.extract_strided_slice %6 {offsets = [5, 0], sizes = [1, 128], strides = [1, 1]} : vector<8x128xf32> to vector<1x128xf32>
    %cst_24 = arith.constant dense<0.000000e+00> : vector<1x128xf32>
    %57 = tpu.matmul %49, %7, %cst_24 {dimension_numbers = #tpu.dot_dimension_numbers<[1], [0], [0], [1], [0, 0, 1, 1], [], []>} : vector<1x128xbf16>, vector<128x128xbf16>, vector<1x128xf32> -> vector<1x128xf32>
    %58 = arith.addf %56, %57 : vector<1x128xf32>
    %59 = math.tanh %58 : vector<1x128xf32>
    %60 = arith.truncf %59 : vector<1x128xf32> to vector<1x128xbf16>
    %cst_25 = arith.constant dense<0.000000e+00> : vector<1x128xf32>
    %61 = tpu.matmul %49, %8, %cst_25 {dimension_numbers = #tpu.dot_dimension_numbers<[1], [0], [0], [1], [0, 0, 1, 1], [], []>} : vector<1x128xbf16>, vector<128x128xbf16>, vector<1x128xf32> -> vector<1x128xf32>
    %62 = arith.addf %61, %10 : vector<1x128xf32>
    %cst_26 = arith.constant dense<0.000000e+00> : vector<1x128xf32>
    %63 = tpu.matmul %55, %9, %cst_26 {dimension_numbers = #tpu.dot_dimension_numbers<[1], [0], [0], [1], [0, 0, 1, 1], [], []>} : vector<1x128xbf16>, vector<128x128xbf16>, vector<1x128xf32> -> vector<1x128xf32>
    %64 = arith.addf %62, %63 : vector<1x128xf32>
    %65 = math.tanh %64 : vector<1x128xf32>
    %66 = arith.truncf %65 : vector<1x128xf32> to vector<1x128xbf16>
    %67 = vector.extract_strided_slice %6 {offsets = [6, 0], sizes = [1, 128], strides = [1, 1]} : vector<8x128xf32> to vector<1x128xf32>
    %cst_27 = arith.constant dense<0.000000e+00> : vector<1x128xf32>
    %68 = tpu.matmul %60, %7, %cst_27 {dimension_numbers = #tpu.dot_dimension_numbers<[1], [0], [0], [1], [0, 0, 1, 1], [], []>} : vector<1x128xbf16>, vector<128x128xbf16>, vector<1x128xf32> -> vector<1x128xf32>
    %69 = arith.addf %67, %68 : vector<1x128xf32>
    %70 = math.tanh %69 : vector<1x128xf32>
    %71 = arith.truncf %70 : vector<1x128xf32> to vector<1x128xbf16>
    %cst_28 = arith.constant dense<0.000000e+00> : vector<1x128xf32>
    %72 = tpu.matmul %60, %8, %cst_28 {dimension_numbers = #tpu.dot_dimension_numbers<[1], [0], [0], [1], [0, 0, 1, 1], [], []>} : vector<1x128xbf16>, vector<128x128xbf16>, vector<1x128xf32> -> vector<1x128xf32>
    %73 = arith.addf %72, %10 : vector<1x128xf32>
    %cst_29 = arith.constant dense<0.000000e+00> : vector<1x128xf32>
    %74 = tpu.matmul %66, %9, %cst_29 {dimension_numbers = #tpu.dot_dimension_numbers<[1], [0], [0], [1], [0, 0, 1, 1], [], []>} : vector<1x128xbf16>, vector<128x128xbf16>, vector<1x128xf32> -> vector<1x128xf32>
    %75 = arith.addf %73, %74 : vector<1x128xf32>
    %76 = math.tanh %75 : vector<1x128xf32>
    %77 = arith.truncf %76 : vector<1x128xf32> to vector<1x128xbf16>
    %78 = vector.extract_strided_slice %6 {offsets = [7, 0], sizes = [1, 128], strides = [1, 1]} : vector<8x128xf32> to vector<1x128xf32>
    %cst_30 = arith.constant dense<0.000000e+00> : vector<1x128xf32>
    %79 = tpu.matmul %71, %7, %cst_30 {dimension_numbers = #tpu.dot_dimension_numbers<[1], [0], [0], [1], [0, 0, 1, 1], [], []>} : vector<1x128xbf16>, vector<128x128xbf16>, vector<1x128xf32> -> vector<1x128xf32>
    %80 = arith.addf %78, %79 : vector<1x128xf32>
    %81 = math.tanh %80 : vector<1x128xf32>
    %82 = arith.truncf %81 : vector<1x128xf32> to vector<1x128xbf16>
    %cst_31 = arith.constant dense<0.000000e+00> : vector<1x128xf32>
    %83 = tpu.matmul %71, %8, %cst_31 {dimension_numbers = #tpu.dot_dimension_numbers<[1], [0], [0], [1], [0, 0, 1, 1], [], []>} : vector<1x128xbf16>, vector<128x128xbf16>, vector<1x128xf32> -> vector<1x128xf32>
    %84 = arith.addf %83, %10 : vector<1x128xf32>
    %cst_32 = arith.constant dense<0.000000e+00> : vector<1x128xf32>
    %85 = tpu.matmul %77, %9, %cst_32 {dimension_numbers = #tpu.dot_dimension_numbers<[1], [0], [0], [1], [0, 0, 1, 1], [], []>} : vector<1x128xbf16>, vector<128x128xbf16>, vector<1x128xf32> -> vector<1x128xf32>
    %86 = arith.addf %84, %85 : vector<1x128xf32>
    %87 = math.tanh %86 : vector<1x128xf32>
    %88 = arith.truncf %87 : vector<1x128xf32> to vector<1x128xbf16>
    %cst_33 = arith.constant dense<0.000000e+00> : vector<1x128xf32>
    %89 = tpu.matmul %82, %8, %cst_33 {dimension_numbers = #tpu.dot_dimension_numbers<[1], [0], [0], [1], [0, 0, 1, 1], [], []>} : vector<1x128xbf16>, vector<128x128xbf16>, vector<1x128xf32> -> vector<1x128xf32>
    %90 = arith.addf %89, %10 : vector<1x128xf32>
    %cst_34 = arith.constant dense<0.000000e+00> : vector<1x128xf32>
    %91 = tpu.matmul %88, %9, %cst_34 {dimension_numbers = #tpu.dot_dimension_numbers<[1], [0], [0], [1], [0, 0, 1, 1], [], []>} : vector<1x128xbf16>, vector<128x128xbf16>, vector<1x128xf32> -> vector<1x128xf32>
    %92 = arith.addf %90, %91 : vector<1x128xf32>
    %93 = math.tanh %92 : vector<1x128xf32>
    %94 = tpu.concatenate %21, %32, %43, %54, %65, %76, %87, %93 in 0 : vector<1x128xf32>, vector<1x128xf32>, vector<1x128xf32>, vector<1x128xf32>, vector<1x128xf32>, vector<1x128xf32>, vector<1x128xf32>, vector<1x128xf32> -> vector<8x128xf32>
    %95 = arith.truncf %94 : vector<8x128xf32> to vector<8x128xbf16>
    %c0_35 = arith.constant 0 : index
    %c0_36 = arith.constant 0 : index
    %96 = vector.load %arg8[%c0_35, %c0_36] : memref<128x128xbf16, #tpu.memory_space<vmem>>, vector<128x128xbf16>
    %cst_37 = arith.constant dense<0.000000e+00> : vector<8x128xf32>
    %97 = tpu.matmul %95, %96, %cst_37 {dimension_numbers = #tpu.dot_dimension_numbers<[1], [0], [0], [1], [0, 0, 1, 1], [], []>} : vector<8x128xbf16>, vector<128x128xbf16>, vector<8x128xf32> -> vector<8x128xf32>
    %c0_38 = arith.constant 0 : index
    %c0_39 = arith.constant 0 : index
    %98 = vector.load %arg9[%c0_38, %c0_39] : memref<1x128xf32, #tpu.memory_space<vmem>>, vector<1x128xf32>
    %99 = vector.broadcast %98 : vector<1x128xf32> to vector<8x128xf32>
    %100 = arith.addf %97, %99 : vector<8x128xf32>
    %c0_40 = arith.constant 0 : index
    %c0_41 = arith.constant 0 : index
    %101 = vector.load %arg10[%c0_40, %c0_41] : memref<8x128xf32, #tpu.memory_space<vmem>>, vector<8x128xf32>
    tpu.vector_store %arg10[%c0_40, %c0_41], %100 {strides = array<i32>} : memref<8x128xf32, #tpu.memory_space<vmem>>, vector<8x128xf32>,
    return
  }
  func.func @transform_0(%arg0: i32) -> (i32, i32) {
    %c0_i32 = arith.constant 0 : i32
    %c0_i32_0 = arith.constant 0 : i32
    %c0_i32_1 = arith.constant 0 : i32
    return %c0_i32, %c0_i32_0 : i32, i32
  }
  func.func @transform_1(%arg0: i32) -> (i32, i32) {
    %c0_i32 = arith.constant 0 : i32
    %c0_i32_0 = arith.constant 0 : i32
    %c0_i32_1 = arith.constant 0 : i32
    return %c0_i32, %c0_i32_0 : i32, i32
  }
  func.func @transform_2(%arg0: i32) -> (i32, i32) {
    %c0_i32 = arith.constant 0 : i32
    %c0_i32_0 = arith.constant 0 : i32
    %c0_i32_1 = arith.constant 0 : i32
    return %c0_i32, %c0_i32_0 : i32, i32
  }
  func.func @transform_3(%arg0: i32) -> (i32, i32) {
    %c0_i32 = arith.constant 0 : i32
    %c0_i32_0 = arith.constant 0 : i32
    %c0_i32_1 = arith.constant 0 : i32
    return %c0_i32, %c0_i32_0 : i32, i32
  }
  func.func @transform_4(%arg0: i32) -> (i32, i32) {
    %c0_i32 = arith.constant 0 : i32
    %c0_i32_0 = arith.constant 0 : i32
    %c0_i32_1 = arith.constant 0 : i32
    return %c0_i32, %c0_i32_0 : i32, i32
  }
  func.func @transform_5(%arg0: i32) -> (i32, i32) {
    %c0_i32 = arith.constant 0 : i32
    %c0_i32_0 = arith.constant 0 : i32
    %c0_i32_1 = arith.constant 0 : i32
    return %c0_i32, %c0_i32_0 : i32, i32
  }
  func.func @transform_6(%arg0: i32) -> (i32, i32) {
    %c0_i32 = arith.constant 0 : i32
    %c0_i32_0 = arith.constant 0 : i32
    %c0_i32_1 = arith.constant 0 : i32
    return %c0_i32, %c0_i32_0 : i32, i32
  }
  func.func @transform_7(%arg0: i32) -> (i32, i32) {
    %c0_i32 = arith.constant 0 : i32
    %c0_i32_0 = arith.constant 0 : i32
    %c0_i32_1 = arith.constant 0 : i32
    return %c0_i32, %c0_i32_0 : i32, i32
  }
  func.func @transform_8(%arg0: i32) -> (i32, i32) {
    %c0_i32 = arith.constant 0 : i32
    %c0_i32_0 = arith.constant 0 : i32
    %c0_i32_1 = arith.constant 0 : i32
    return %c0_i32, %c0_i32_0 : i32, i32
  }
  func.func @transform_9(%arg0: i32) -> (i32, i32) {
    %c0_i32 = arith.constant 0 : i32
    %c0_i32_0 = arith.constant 0 : i32
    %c0_i32_1 = arith.constant 0 : i32
    return %c0_i32, %c0_i32_0 : i32, i32
  }
}

</mosaic_0001>

<bundles_post_ra>
// kernel: rnn_forward.1
= control target key start
LH: loop header
LB: loop body
LE: loop exit
PB: predicated region body
PF: predicated region fallthrough
CT: control target
= control target key end

     0   :  { %v2229_v0 = vmov 0.0   ;;  %vm2230_vm0 = vmmov 0   ;;  %vm50_vm1 = vcmask 130048   ;;  %vm1282_vm2 = vcmask 1040384   ;;  %s2897_s1 = inlined_call_operand.vmem [shape: bf16[16,128], index: 1, kind: input, shape index: {}]   ;;  %s2898_s0 = inlined_call_operand.vmem [shape: f32[8,16], index: 0, kind: input, shape index: {}]   ;;  %s2899_s3 = inlined_call_operand.vmem [shape: bf16[128,128], index: 3, kind: input, shape index: {}]   ;;  %s2900_s4 = inlined_call_operand.vmem [shape: bf16[128,128], index: 4, kind: input, shape index: {}]   ;;  %s2901_s2 = inlined_call_operand.vmem [shape: f32[1,128], index: 2, kind: input, shape index: {}]   ;;  %s2902_s5 = inlined_call_operand.vmem [shape: bf16[128,128], index: 5, kind: input, shape index: {}]   ;;  %s2903_s6 = inlined_call_operand.vmem [shape: f32[1,128], index: 6, kind: input, shape index: {}]   ;;  %s2904_s7 = inlined_call_operand.vmem [shape: bf16[128,128], index: 7, kind: input, shape index: {}]   ;;  %s2905_s8 = inlined_call_operand.vmem [shape: f32[1,128], index: 8, kind: input, shape index: {}]   ;;  %s2906_s9 = inlined_call_operand.vmem [shape: f32[8,128], index: 9, kind: output, shape index: {}]  }
   0x1   :  { %1658 = vmatprep.subr.bf16.mxu0 %v2229_v0  ;;  %v2161_v1 = vld [vmem:[%s2897_s1] sm:$0xff]   ;;  %1660 = vmatprep.mubr.msk.bf16.mxu0 %vm2230_vm0, %v2229_v0  ;;  %v2308_v6 = vld [vmem:[%s2899_s3 + $0x8] sm:$0xff]   ;;  %v2324_v8 = vld [vmem:[%s2899_s3 + $0x10] sm:$0xff]   ;;  %vm1284_vm3 = vcmask 1041408   ;;  %vm1286_vm4 = vcmask 1042432   ;;  %vm1288_vm5 = vcmask 1043456  }
   0x2   :  { %v33_v2 = vld [vmem:[%s2898_s0] sm:$0xff]  ;;  %1664 = vmatprep.subr.bf16.mxu1 %v2229_v0  ;;  %1680 = vmatprep.mubr.msk.bf16.mxu1 %vm2230_vm0, %v2229_v0  ;;  %v2315_v7 = vld [vmem:[%s2900_s4 + $0x8] sm:$0xff]   ;;  %v2330_v9 = vld [vmem:[%s2900_s4 + $0x10] sm:$0xff]   ;;  %vm1290_vm6 = vcmask 1044480   ;;  %vm1292_vm7 = vcmask 1045504   ;;  %vm1294_vm8 = vcmask 1046528  }
   0x3   :  { %1659 = vmatpush3.bf16.msra.mxu0 %v2161_v1  ;;  %v34_v3 = vpack.c.bf16 %v33_v2, %v33_v2  ;;  %v2296_v4 = vld [vmem:[%s2899_s3] sm:$0xff]   ;;  %v2336_v10 = vld [vmem:[%s2899_s3 + $0x18] sm:$0xff]   ;;  %v2369_v14 = vld [vmem:[%s2899_s3 + $0x28] sm:$0xff]  }
   0x4   :  { %1684 = vmatprep.subr.bf16.mxu0 %v2229_v0  ;;  %v2302_v5 = vld [vmem:[%s2900_s4] sm:$0xff]   ;;  %1665 = vmatpush3.bf16.msra.mxu1 %v2296_v4  ;;  %v2343_v11 = vld [vmem:[%s2900_s4 + $0x18] sm:$0xff]   ;;  %v2374_v15 = vld [vmem:[%s2900_s4 + $0x28] sm:$0xff]  }
   0x5   :  { %1666 = vmatprep.subr.bf16.mxu1 %v2229_v0  ;;  %v2355_v12 = vld [vmem:[%s2899_s3 + $0x20] sm:$0xff]   ;;  %v2381_v16 = vld [vmem:[%s2899_s3 + $0x30] sm:$0xff]   ;;  %v2395_v18 = vld [vmem:[%s2899_s3 + $0x38] sm:$0xff]  }
   0x6   :  { %1661 = vmatmul.mubr.msk.bf16.vlgmr.msra.gmra.mrb[0].mxu0 %vm50_vm1, %v34_v3  ;;  %v2360_v13 = vld [vmem:[%s2900_s4 + $0x20] sm:$0xff]   ;;  %v2386_v17 = vld [vmem:[%s2900_s4 + $0x30] sm:$0xff]   ;;  %v2400_v19 = vld [vmem:[%s2900_s4 + $0x38] sm:$0xff]  }
   0x7   :  { %1685 = vmatpush3.bf16.msra.mxu0 %v2302_v5  ;;  %1700 = vmatprep.mubr.msk.bf16.mxu0 %vm2230_vm0, %v2229_v0  ;;  %v1413_v20 = vld [vmem:[%s2901_s2] ss:$0 sm:$0xff]  ;;  %v2460_v42 = vld [vmem:[%s2902_s5 + $0x8] sm:$0xff]   ;;  %v2473_v43 = vld [vmem:[%s2902_s5 + $0x10] sm:$0xff]  }
   0x8   :  { %1686 = vmatprep.subr.bf16.mxu0 %v2229_v0  ;;  %1667 = vmatpush3.bf16.msra.mxu1 %v2308_v6  ;;  %v2454_v40 = vld [vmem:[%s2902_s5] sm:$0xff]   ;;  %v2482_v44 = vld [vmem:[%s2902_s5 + $0x18] sm:$0xff]   ;;  %v2506_v48 = vld [vmem:[%s2902_s5 + $0x28] sm:$0xff]  }
   0x9   :  { %1668 = vmatprep.subr.bf16.mxu1 %v2229_v0  ;;  %v2487_v45 = vld [vmem:[%s2903_s6] sm:$0x1]  ;;  %v2515_v49 = vld [vmem:[%s2902_s5 + $0x30] sm:$0xff]   ;;  %v2524_v50 = vld [vmem:[%s2902_s5 + $0x38] sm:$0xff]  }
   0xa   :  { %v2497_v47 = vld [vmem:[%s2902_s5 + $0x20] sm:$0xff]  }
   0xb   :  { %1687 = vmatpush3.bf16.msra.mxu0 %v2315_v7 }
   0xc   :  { %1688 = vmatprep.subr.bf16.mxu0 %v2229_v0  ;;  %1669 = vmatpush3.bf16.msra.mxu1 %v2324_v8 }
   0xd   :  { %1670 = vmatprep.subr.bf16.mxu1 %v2229_v0 }
   0xf   :  { %1689 = vmatpush3.bf16.msra.mxu0 %v2330_v9 }
  0x10   :  { %1690 = vmatprep.subr.bf16.mxu0 %v2229_v0  ;;  %1671 = vmatpush3.bf16.msra.mxu1 %v2336_v10 }
  0x11   :  { %1672 = vmatprep.subr.bf16.mxu1 %v2229_v0 }
  0x13   :  { %1691 = vmatpush3.bf16.msra.mxu0 %v2343_v11 }
  0x14   :  { %1692 = vmatprep.subr.bf16.mxu0 %v2229_v0  ;;  %1673 = vmatpush3.bf16.msra.mxu1 %v2355_v12 }
  0x15   :  { %1674 = vmatprep.subr.bf16.mxu1 %v2229_v0 }
  0x17   :  { %1693 = vmatpush3.bf16.msra.mxu0 %v2360_v13 }
  0x18   :  { %1694 = vmatprep.subr.bf16.mxu0 %v2229_v0  ;;  %1675 = vmatpush3.bf16.msra.mxu1 %v2369_v14 }
  0x19   :  { %1676 = vmatprep.subr.bf16.mxu1 %v2229_v0 }
  0x1b   :  { %1695 = vmatpush3.bf16.msra.mxu0 %v2374_v15 }
  0x1c   :  { %1696 = vmatprep.subr.bf16.mxu0 %v2229_v0  ;;  %1677 = vmatpush3.bf16.msra.mxu1 %v2381_v16 }
  0x1d   :  { %1678 = vmatprep.subr.bf16.mxu1 %v2229_v0 }
  0x1f   :  { %1697 = vmatpush3.bf16.msra.mxu0 %v2386_v17 }
  0x20   :  { %1698 = vmatprep.subr.bf16.mxu0 %v2229_v0  ;;  %1679 = vmatpush3.bf16.msra.mxu1 %v2395_v18 }
  0x21   :  { %1704 = vmatprep.subr.bf16.mxu1 %v2229_v0 }
  0x23   :  { %1699 = vmatpush3.bf16.msra.mxu0 %v2400_v19 }
  0x24   :  { %1724 = vmatprep.subr.bf16.mxu0 %v2229_v0 }
  0xd9   :  { %v88_v21 = vpop.f32.mrb[0].mxu0 }
  0xda   :  { %v2411_v22 = vadd.f32 %v1413_v20, %v88_v21  ;;  %v1662_v23 = vpop.f32.mrb[1].mxu0 }
  0xdb   :  { %v91_v24 = vpop.f32.mrb[2].mxu0 }
  0xdc   :  { %v1663_v25 = vpop.f32.mrb[3].mxu0  ;;  %2194 = vtanh.f32 %v2411_v22 }
  0xe6   :  { %v2195_v26 = vpop.eup %2194 }
  0xe7   :  { %v144_v27 = vpack.c.bf16 %v2195_v26, %v2195_v26 }
  0xe9   :  { %1681 = vmatmul.mubr.bf16.vlgmr.msra.gmra.mrb[0].mxu1 %v144_v27  ;;  %1701 = vmatmul.mubr.bf16.vlgmr.msra.gmra.mrb[4].mxu0 %v144_v27 }
  0xea   :  { %1725 = vmatpush3.bf16.msra.mxu0 %v2302_v5  ;;  %1705 = vmatpush3.bf16.msra.mxu1 %v2296_v4 }
  0xeb   :  { %1726 = vmatprep.subr.bf16.mxu0 %v2229_v0  ;;  %1706 = vmatprep.subr.bf16.mxu1 %v2229_v0 }
  0xec   :  { %1720 = vmatprep.mubr.msk.bf16.mxu1 %vm2230_vm0, %v2229_v0  ;;  %1740 = vmatprep.mubr.msk.bf16.mxu0 %vm2230_vm0, %v2229_v0 }
  0xee   :  { %1727 = vmatpush3.bf16.msra.mxu0 %v2315_v7  ;;  %1707 = vmatpush3.bf16.msra.mxu1 %v2308_v6 }
  0xef   :  { %1728 = vmatprep.subr.bf16.mxu0 %v2229_v0  ;;  %1708 = vmatprep.subr.bf16.mxu1 %v2229_v0 }
  0xf2   :  { %1729 = vmatpush3.bf16.msra.mxu0 %v2330_v9  ;;  %1709 = vmatpush3.bf16.msra.mxu1 %v2324_v8 }
  0xf3   :  { %1730 = vmatprep.subr.bf16.mxu0 %v2229_v0  ;;  %1710 = vmatprep.subr.bf16.mxu1 %v2229_v0 }
  0xf6   :  { %1731 = vmatpush3.bf16.msra.mxu0 %v2343_v11  ;;  %1711 = vmatpush3.bf16.msra.mxu1 %v2336_v10 }
  0xf7   :  { %1732 = vmatprep.subr.bf16.mxu0 %v2229_v0  ;;  %1712 = vmatprep.subr.bf16.mxu1 %v2229_v0 }
  0xfa   :  { %1733 = vmatpush3.bf16.msra.mxu0 %v2360_v13  ;;  %1713 = vmatpush3.bf16.msra.mxu1 %v2355_v12 }
  0xfb   :  { %1734 = vmatprep.subr.bf16.mxu0 %v2229_v0  ;;  %1714 = vmatprep.subr.bf16.mxu1 %v2229_v0 }
  0xfe   :  { %1735 = vmatpush3.bf16.msra.mxu0 %v2374_v15  ;;  %1715 = vmatpush3.bf16.msra.mxu1 %v2369_v14 }
  0xff   :  { %1736 = vmatprep.subr.bf16.mxu0 %v2229_v0  ;;  %1716 = vmatprep.subr.bf16.mxu1 %v2229_v0 }
 0x102   :  { %1737 = vmatpush3.bf16.msra.mxu0 %v2386_v17  ;;  %1717 = vmatpush3.bf16.msra.mxu1 %v2381_v16 }
 0x103   :  { %1738 = vmatprep.subr.bf16.mxu0 %v2229_v0  ;;  %1718 = vmatprep.subr.bf16.mxu1 %v2229_v0 }
 0x106   :  { %1739 = vmatpush3.bf16.msra.mxu0 %v2400_v19  ;;  %1719 = vmatpush3.bf16.msra.mxu1 %v2395_v18 }
 0x107   :  { %1744 = vmatprep.subr.bf16.mxu0 %v2229_v0  ;;  %1764 = vmatprep.subr.bf16.mxu1 %v2229_v0 }
 0x1bc   :  { %v227_v28 = vpop.f32.mrb[0].mxu1  ;;  %v321_v29 = vpop.f32.mrb[4].mxu0 }
 0x1bd   :  { %v234_v30 = vrot.slane %v227_v28, 7  ;;  %v1682_v31 = vpop.f32.mrb[1].mxu1  ;;  %v1702_v32 = vpop.f32.mrb[5].mxu0  ;;  %v322_v46 = vadd.f32 %v321_v29, %v2487_v45 }
 0x1be   :  { %v230_v33 = vpop.f32.mrb[2].mxu1  ;;  %v324_v34 = vpop.f32.mrb[6].mxu0 }
 0x1bf   :  { %v236_v35 = vadd.f32 %v234_v30, %v2411_v22  ;;  %v1683_v36 = vpop.f32.mrb[3].mxu1  ;;  %v1703_v37 = vpop.f32.mrb[7].mxu0 }
 0x1c1   :  { %2196 = vtanh.f32 %v236_v35 }
 0x1c2   :  { %2198 = vtanh.f32 %v322_v46 }
 0x1cb   :  { %v2197_v38 = vpop.eup %2196 }
 0x1cc   :  { %v238_v39 = vpack.c.bf16 %v2197_v38, %v2197_v38  ;;  %v2528_v51 = vpop.eup %2198 }
 0x1cd   :  { %v328_v52 = vpack.c.bf16 %v2528_v51, %v2528_v51 }
 0x1ce   :  { %v330_v41 = vshrl.u32 %v238_v39, 16 }
 0x1d0   :  { %1721 = vmatmul.mubr.bf16.vlgmr.msra.gmra.mrb[4].mxu1 %v330_v41  ;;  %1741 = vmatmul.mubr.bf16.vlgmr.msra.gmra.mrb[8].mxu0 %v330_v41 }
 0x1d1   :  { %1745 = vmatpush3.bf16.msra.mxu0 %v2454_v40  ;;  %1760 = vmatprep.mubr.msk.bf16.mxu0 %vm2230_vm0, %v2229_v0 }
 0x1d2   :  { %1746 = vmatprep.subr.bf16.mxu0 %v2229_v0  ;;  %1765 = vmatpush3.bf16.msra.mxu1 %v2296_v4 }
 0x1d3   :  { %1766 = vmatprep.subr.bf16.mxu1 %v2229_v0  ;;  %1780 = vmatprep.mubr.msk.bf16.mxu1 %vm2230_vm0, %v2229_v0 }
 0x1d5   :  { %1747 = vmatpush3.bf16.msra.mxu0 %v2460_v42 }
 0x1d6   :  { %1748 = vmatprep.subr.bf16.mxu0 %v2229_v0  ;;  %1767 = vmatpush3.bf16.msra.mxu1 %v2308_v6 }
 0x1d7   :  { %1768 = vmatprep.subr.bf16.mxu1 %v2229_v0 }
 0x1d9   :  { %1749 = vmatpush3.bf16.msra.mxu0 %v2473_v43 }
 0x1da   :  { %1750 = vmatprep.subr.bf16.mxu0 %v2229_v0  ;;  %1769 = vmatpush3.bf16.msra.mxu1 %v2324_v8 }
 0x1db   :  { %1770 = vmatprep.subr.bf16.mxu1 %v2229_v0 }
 0x1dd   :  { %1751 = vmatpush3.bf16.msra.mxu0 %v2482_v44 }
 0x1de   :  { %1752 = vmatprep.subr.bf16.mxu0 %v2229_v0  ;;  %1771 = vmatpush3.bf16.msra.mxu1 %v2336_v10 }
 0x1df   :  { %1772 = vmatprep.subr.bf16.mxu1 %v2229_v0 }
 0x1e1   :  { %1753 = vmatpush3.bf16.msra.mxu0 %v2497_v47 }
 0x1e2   :  { %1754 = vmatprep.subr.bf16.mxu0 %v2229_v0  ;;  %1773 = vmatpush3.bf16.msra.mxu1 %v2355_v12 }
 0x1e3   :  { %1774 = vmatprep.subr.bf16.mxu1 %v2229_v0 }
 0x1e5   :  { %1755 = vmatpush3.bf16.msra.mxu0 %v2506_v48 }
 0x1e6   :  { %1756 = vmatprep.subr.bf16.mxu0 %v2229_v0  ;;  %1775 = vmatpush3.bf16.msra.mxu1 %v2369_v14 }
 0x1e7   :  { %1776 = vmatprep.subr.bf16.mxu1 %v2229_v0 }
 0x1e9   :  { %1757 = vmatpush3.bf16.msra.mxu0 %v2515_v49 }
 0x1ea   :  { %1758 = vmatprep.subr.bf16.mxu0 %v2229_v0  ;;  %1777 = vmatpush3.bf16.msra.mxu1 %v2381_v16 }
 0x1eb   :  { %1778 = vmatprep.subr.bf16.mxu1 %v2229_v0 }
 0x1ed   :  { %1759 = vmatpush3.bf16.msra.mxu0 %v2524_v50 }
 0x1ee   :  { %1779 = vmatpush3.bf16.msra.mxu1 %v2395_v18  ;;  %1824 = vmatprep.subr.bf16.mxu0 %v2229_v0 }
 0x1ef   :  { %1784 = vmatprep.subr.bf16.mxu1 %v2229_v0 }
 0x1f0   :  { %1761 = vmatmul.mubr.bf16.vlgmr.msra.gmra.mrb[8].mxu0 %v328_v52 }
 0x1f1   :  { %1825 = vmatpush3.bf16.msra.mxu0 %v2296_v4  ;;  %1840 = vmatprep.mubr.msk.bf16.mxu0 %vm2230_vm0, %v2229_v0 }
 0x1f2   :  { %1826 = vmatprep.subr.bf16.mxu0 %v2229_v0 }
 0x1f5   :  { %1827 = vmatpush3.bf16.msra.mxu0 %v2308_v6 }
 0x1f6   :  { %1828 = vmatprep.subr.bf16.mxu0 %v2229_v0 }
 0x1f9   :  { %1829 = vmatpush3.bf16.msra.mxu0 %v2324_v8 }
 0x1fa   :  { %1830 = vmatprep.subr.bf16.mxu0 %v2229_v0 }
 0x1fd   :  { %1831 = vmatpush3.bf16.msra.mxu0 %v2336_v10 }
 0x1fe   :  { %1832 = vmatprep.subr.bf16.mxu0 %v2229_v0 }
 0x201   :  { %1833 = vmatpush3.bf16.msra.mxu0 %v2355_v12 }
 0x202   :  { %1834 = vmatprep.subr.bf16.mxu0 %v2229_v0 }
 0x205   :  { %1835 = vmatpush3.bf16.msra.mxu0 %v2369_v14 }
 0x206   :  { %1836 = vmatprep.subr.bf16.mxu0 %v2229_v0 }
 0x209   :  { %1837 = vmatpush3.bf16.msra.mxu0 %v2381_v16 }
 0x20a   :  { %1838 = vmatprep.subr.bf16.mxu0 %v2229_v0 }
 0x20d   :  { %1839 = vmatpush3.bf16.msra.mxu0 %v2395_v18 }
 0x20e   :  { %1844 = vmatprep.subr.bf16.mxu0 %v2229_v0 }
 0x2a3   :  { %v367_v53 = vpop.f32.mrb[4].mxu1 }
 0x2a4   :  { %v374_v54 = vrot.slane %v367_v53, 6  ;;  %v1722_v55 = vpop.f32.mrb[5].mxu1 }
 0x2a5   :  { %v370_v56 = vpop.f32.mrb[6].mxu1 }
 0x2a6   :  { %v376_v57 = vadd.f32 %v374_v54, %v2411_v22  ;;  %v1723_v58 = vpop.f32.mrb[7].mxu1 }
 0x2a8   :  { %2200 = vtanh.f32 %v376_v57 }
 0x2b2   :  { %v2201_v59 = vpop.eup %2200 }
 0x2b3   :  { %v378_v60 = vpack.c.bf16 %v2201_v59, %v2201_v59 }
 0x2b5   :  { %v511_v61 = vrot.slane %v378_v60, 1 }
 0x2b7   :  { %1781 = vmatmul.mubr.bf16.vlgmr.msra.gmra.mrb[8].mxu1 %v511_v61 }
 0x2b8   :  { %1785 = vmatpush3.bf16.msra.mxu1 %v2302_v5  ;;  %1800 = vmatprep.mubr.msk.bf16.mxu1 %vm2230_vm0, %v2229_v0 }
 0x2b9   :  { %1786 = vmatprep.subr.bf16.mxu1 %v2229_v0 }
 0x2bc   :  { %1787 = vmatpush3.bf16.msra.mxu1 %v2315_v7 }
 0x2bd   :  { %1788 = vmatprep.subr.bf16.mxu1 %v2229_v0 }
 0x2c0   :  { %1789 = vmatpush3.bf16.msra.mxu1 %v2330_v9 }
 0x2c1   :  { %1790 = vmatprep.subr.bf16.mxu1 %v2229_v0 }
 0x2c3   :  { %v501_v62 = vpop.f32.mrb[8].mxu0 }
 0x2c4   :  { %v1762_v63 = vpop.f32.mrb[9].mxu0  ;;  %1791 = vmatpush3.bf16.msra.mxu1 %v2343_v11  ;;  %v2124_v3 = vadd.f32 %v501_v62, %v2487_v45 }
 0x2c5   :  { %v504_v1 = vpop.f32.mrb[10].mxu0  ;;  %1792 = vmatprep.subr.bf16.mxu1 %v2229_v0 }
 0x2c6   :  { %v1763_v2 = vpop.f32.mrb[11].mxu0  ;;  %2202 = vtanh.f32 %v2124_v3 }
 0x2c8   :  { %1793 = vmatpush3.bf16.msra.mxu1 %v2360_v13 }
 0x2c9   :  { %1794 = vmatprep.subr.bf16.mxu1 %v2229_v0 }
 0x2cc   :  { %1795 = vmatpush3.bf16.msra.mxu1 %v2374_v15 }
 0x2cd   :  { %1796 = vmatprep.subr.bf16.mxu1 %v2229_v0 }
 0x2d0   :  { %1797 = vmatpush3.bf16.msra.mxu1 %v2386_v17  ;;  %v2591_v20 = vpop.eup %2202 }
 0x2d1   :  { %1798 = vmatprep.subr.bf16.mxu1 %v2229_v0  ;;  %v509_v21 = vpack.c.bf16 %v2591_v20, %v2591_v20  ;;  %v1262_v38 = vrot.slane %v2591_v20, 7 }
 0x2d3   :  { %v1283_v46 = vsel %vm1282_vm2, %v2528_v51, %v1262_v38 }
 0x2d4   :  { %1799 = vmatpush3.bf16.msra.mxu1 %v2400_v19 }
 0x2d5   :  { %1804 = vmatprep.subr.bf16.mxu1 %v2229_v0 }
 0x2d7   :  { %1801 = vmatmul.mubr.bf16.vlgmr.msra.gmra.mrb[12].mxu1 %v511_v61 }
 0x2d8   :  { %1805 = vmatpush3.bf16.msra.mxu1 %v2454_v40  ;;  %1820 = vmatprep.mubr.msk.bf16.mxu1 %vm2230_vm0, %v2229_v0 }
 0x2d9   :  { %1806 = vmatprep.subr.bf16.mxu1 %v2229_v0 }
 0x2dc   :  { %1807 = vmatpush3.bf16.msra.mxu1 %v2460_v42 }
 0x2dd   :  { %1808 = vmatprep.subr.bf16.mxu1 %v2229_v0 }
 0x2e0   :  { %1809 = vmatpush3.bf16.msra.mxu1 %v2473_v43 }
 0x2e1   :  { %1810 = vmatprep.subr.bf16.mxu1 %v2229_v0 }
 0x2e4   :  { %1811 = vmatpush3.bf16.msra.mxu1 %v2482_v44 }
 0x2e5   :  { %1812 = vmatprep.subr.bf16.mxu1 %v2229_v0 }
 0x2e8   :  { %1813 = vmatpush3.bf16.msra.mxu1 %v2497_v47 }
 0x2e9   :  { %1814 = vmatprep.subr.bf16.mxu1 %v2229_v0 }
 0x2ec   :  { %1815 = vmatpush3.bf16.msra.mxu1 %v2506_v48 }
 0x2ed   :  { %1816 = vmatprep.subr.bf16.mxu1 %v2229_v0 }
 0x2f0   :  { %1817 = vmatpush3.bf16.msra.mxu1 %v2515_v49 }
 0x2f1   :  { %1818 = vmatprep.subr.bf16.mxu1 %v2229_v0 }
 0x2f4   :  { %1819 = vmatpush3.bf16.msra.mxu1 %v2524_v50 }
 0x2f5   :  { %1884 = vmatprep.subr.bf16.mxu1 %v2229_v0 }
 0x2f7   :  { %1821 = vmatmul.mubr.bf16.vlgmr.msra.gmra.mrb[12].mxu1 %v509_v21 }
 0x2f8   :  { %1885 = vmatpush3.bf16.msra.mxu1 %v2296_v4  ;;  %1900 = vmatprep.mubr.msk.bf16.mxu1 %vm2230_vm0, %v2229_v0 }
 0x2f9   :  { %1886 = vmatprep.subr.bf16.mxu1 %v2229_v0 }
 0x2fc   :  { %1887 = vmatpush3.bf16.msra.mxu1 %v2308_v6 }
 0x2fd   :  { %1888 = vmatprep.subr.bf16.mxu1 %v2229_v0 }
 0x300   :  { %1889 = vmatpush3.bf16.msra.mxu1 %v2324_v8 }
 0x301   :  { %1890 = vmatprep.subr.bf16.mxu1 %v2229_v0 }
 0x304   :  { %1891 = vmatpush3.bf16.msra.mxu1 %v2336_v10 }
 0x305   :  { %1892 = vmatprep.subr.bf16.mxu1 %v2229_v0 }
 0x308   :  { %1893 = vmatpush3.bf16.msra.mxu1 %v2355_v12 }
 0x309   :  { %1894 = vmatprep.subr.bf16.mxu1 %v2229_v0 }
 0x30c   :  { %1895 = vmatpush3.bf16.msra.mxu1 %v2369_v14 }
 0x30d   :  { %1896 = vmatprep.subr.bf16.mxu1 %v2229_v0 }
 0x310   :  { %1897 = vmatpush3.bf16.msra.mxu1 %v2381_v16 }
 0x311   :  { %1898 = vmatprep.subr.bf16.mxu1 %v2229_v0 }
 0x314   :  { %1899 = vmatpush3.bf16.msra.mxu1 %v2395_v18 }
 0x315   :  { %1904 = vmatprep.subr.bf16.mxu1 %v2229_v0 }
 0x38a   :  { %v547_v23 = vpop.f32.mrb[8].mxu1 }
 0x38b   :  { %v554_v24 = vrot.slane %v547_v23, 5  ;;  %v1782_v25 = vpop.f32.mrb[9].mxu1 }
 0x38c   :  { %v550_v26 = vpop.f32.mrb[10].mxu1 }
 0x38d   :  { %v556_v27 = vadd.f32 %v554_v24, %v2411_v22  ;;  %v1783_v28 = vpop.f32.mrb[11].mxu1 }
 0x38f   :  { %2204 = vtanh.f32 %v556_v27 }
 0x399   :  { %v2205_v29 = vpop.eup %2204 }
 0x39a   :  { %v558_v30 = vpack.c.bf16 %v2205_v29, %v2205_v29 }
 0x39c   :  { %v643_v31 = vshrl.u32 %v558_v30, 16 }
 0x39e   :  { %v645_v32 = vrot.slane %v643_v31, 1 }
 0x3a0   :  { %1841 = vmatmul.mubr.bf16.vlgmr.msra.gmra.mrb[12].mxu0 %v645_v32 }
 0x3a1   :  { %1845 = vmatpush3.bf16.msra.mxu0 %v2302_v5  ;;  %1860 = vmatprep.mubr.msk.bf16.mxu0 %vm2230_vm0, %v2229_v0 }
 0x3a2   :  { %1846 = vmatprep.subr.bf16.mxu0 %v2229_v0 }
 0x3a5   :  { %1847 = vmatpush3.bf16.msra.mxu0 %v2315_v7 }
 0x3a6   :  { %1848 = vmatprep.subr.bf16.mxu0 %v2229_v0 }
 0x3a9   :  { %1849 = vmatpush3.bf16.msra.mxu0 %v2330_v9 }
 0x3aa   :  { %1850 = vmatprep.subr.bf16.mxu0 %v2229_v0 }
 0x3ad   :  { %1851 = vmatpush3.bf16.msra.mxu0 %v2343_v11 }
 0x3ae   :  { %1852 = vmatprep.subr.bf16.mxu0 %v2229_v0 }
 0x3b1   :  { %1853 = vmatpush3.bf16.msra.mxu0 %v2360_v13 }
 0x3b2   :  { %1854 = vmatprep.subr.bf16.mxu0 %v2229_v0 }
 0x3b5   :  { %1855 = vmatpush3.bf16.msra.mxu0 %v2374_v15 }
 0x3b6   :  { %1856 = vmatprep.subr.bf16.mxu0 %v2229_v0 }
 0x3b9   :  { %1857 = vmatpush3.bf16.msra.mxu0 %v2386_v17 }
 0x3ba   :  { %1858 = vmatprep.subr.bf16.mxu0 %v2229_v0 }
 0x3bd   :  { %1859 = vmatpush3.bf16.msra.mxu0 %v2400_v19 }
 0x3be   :  { %1864 = vmatprep.subr.bf16.mxu0 %v2229_v0 }
 0x3c0   :  { %1861 = vmatmul.mubr.bf16.vlgmr.msra.gmra.mrb[16].mxu0 %v645_v32 }
 0x3c1   :  { %1865 = vmatpush3.bf16.msra.mxu0 %v2454_v40  ;;  %1880 = vmatprep.mubr.msk.bf16.mxu0 %vm2230_vm0, %v2229_v0 }
 0x3c2   :  { %1866 = vmatprep.subr.bf16.mxu0 %v2229_v0 }
 0x3c5   :  { %1867 = vmatpush3.bf16.msra.mxu0 %v2460_v42 }
 0x3c6   :  { %1868 = vmatprep.subr.bf16.mxu0 %v2229_v0 }
 0x3c9   :  { %1869 = vmatpush3.bf16.msra.mxu0 %v2473_v43 }
 0x3ca   :  { %v633_v33 = vpop.f32.mrb[12].mxu1  ;;  %1870 = vmatprep.subr.bf16.mxu0 %v2229_v0 }
 0x3cb   :  { %v2125_v34 = vadd.f32 %v633_v33, %v2487_v45  ;;  %v1822_v35 = vpop.f32.mrb[13].mxu1 }
 0x3cc   :  { %v636_v36 = vpop.f32.mrb[14].mxu1 }
 0x3cd   :  { %2206 = vtanh.f32 %v2125_v34  ;;  %v1823_v37 = vpop.f32.mrb[15].mxu1  ;;  %1871 = vmatpush3.bf16.msra.mxu0 %v2482_v44 }
 0x3ce   :  { %1872 = vmatprep.subr.bf16.mxu0 %v2229_v0 }
 0x3d1   :  { %1873 = vmatpush3.bf16.msra.mxu0 %v2497_v47 }
 0x3d2   :  { %1874 = vmatprep.subr.bf16.mxu0 %v2229_v0 }
 0x3d5   :  { %1875 = vmatpush3.bf16.msra.mxu0 %v2506_v48 }
 0x3d6   :  { %1876 = vmatprep.subr.bf16.mxu0 %v2229_v0 }
 0x3d7   :  { %v2207_v39 = vpop.eup %2206 }
 0x3d8   :  { %v1265_v41 = vrot.slane %v2207_v39, 6  ;;  %v641_v53 = vpack.c.bf16 %v2207_v39, %v2207_v39 }
 0x3d9   :  { %1877 = vmatpush3.bf16.msra.mxu0 %v2515_v49 }
 0x3da   :  { %v2652_v52 = vsel %vm1284_vm3, %v1283_v46, %v1265_v41  ;;  %1878 = vmatprep.subr.bf16.mxu0 %v2229_v0 }
 0x3dd   :  { %1879 = vmatpush3.bf16.msra.mxu0 %v2524_v50 }
 0x3de   :  { %1944 = vmatprep.subr.bf16.mxu0 %v2229_v0 }
 0x3e0   :  { %1881 = vmatmul.mubr.bf16.vlgmr.msra.gmra.mrb[16].mxu0 %v641_v53  ;;  %v2227_v53 = vld [vmem:[%s2900_s4 + $0x8] sm:$0xff]  }
 0x3e1   :  { %1945 = vmatpush3.bf16.msra.mxu0 %v2296_v4  ;;  %1960 = vmatprep.mubr.msk.bf16.mxu0 %vm2230_vm0, %v2229_v0 }
 0x3e2   :  { %1946 = vmatprep.subr.bf16.mxu0 %v2229_v0 }
 0x3e5   :  { %1947 = vmatpush3.bf16.msra.mxu0 %v2308_v6 }
 0x3e6   :  { %1948 = vmatprep.subr.bf16.mxu0 %v2229_v0 }
 0x3e9   :  { %1949 = vmatpush3.bf16.msra.mxu0 %v2324_v8 }
 0x3ea   :  { %1950 = vmatprep.subr.bf16.mxu0 %v2229_v0 }
 0x3ed   :  { %1951 = vmatpush3.bf16.msra.mxu0 %v2336_v10 }
 0x3ee   :  { %1952 = vmatprep.subr.bf16.mxu0 %v2229_v0 }
 0x3f1   :  { %1953 = vmatpush3.bf16.msra.mxu0 %v2355_v12 }
 0x3f2   :  { %1954 = vmatprep.subr.bf16.mxu0 %v2229_v0 }
 0x3f5   :  { %1955 = vmatpush3.bf16.msra.mxu0 %v2369_v14 }
 0x3f6   :  { %1956 = vmatprep.subr.bf16.mxu0 %v2229_v0 }
 0x3f9   :  { %1957 = vmatpush3.bf16.msra.mxu0 %v2381_v16 }
 0x3fa   :  { %1958 = vmatprep.subr.bf16.mxu0 %v2229_v0 }
 0x3fd   :  { %1959 = vmatpush3.bf16.msra.mxu0 %v2395_v18 }
 0x3fe   :  { %1964 = vmatprep.subr.bf16.mxu0 %v2229_v0 }
 0x473   :  { %v681_v51 = vpop.f32.mrb[12].mxu0 }
 0x474   :  { %v688_v54 = vrot.slane %v681_v51, 4  ;;  %v1842_v55 = vpop.f32.mrb[13].mxu0  ;;  %v2228_v51 = vld [vmem:[%s2900_s4 + $0x10] sm:$0xff]  }
 0x475   :  { %v684_v56 = vpop.f32.mrb[14].mxu0 }
 0x476   :  { %v690_v57 = vadd.f32 %v688_v54, %v2411_v22  ;;  %v1843_v58 = vpop.f32.mrb[15].mxu0 }
 0x477   :  { %v2186_v58 = vld [vmem:[%s2904_s7] sm:$0xff]  }
 0x478   :  { %2208 = vtanh.f32 %v690_v57 }
 0x482   :  { %v2209_v59 = vpop.eup %2208 }
 0x483   :  { %v692_v60 = vpack.c.bf16 %v2209_v59, %v2209_v59  ;;  %v2187_v59 = vld [vmem:[%s2904_s7 + $0x8] sm:$0xff]  }
 0x485   :  { %v777_v61 = vrot.slane %v692_v60, 2  ;;  %v2188_v60 = vld [vmem:[%s2904_s7 + $0x10] sm:$0xff]  }
 0x487   :  { %1901 = vmatmul.mubr.bf16.vlgmr.msra.gmra.mrb[16].mxu1 %v777_v61 }
 0x488   :  { %1905 = vmatpush3.bf16.msra.mxu1 %v2302_v5  ;;  %1920 = vmatprep.mubr.msk.bf16.mxu1 %vm2230_vm0, %v2229_v0 }
 0x489   :  { %1906 = vmatprep.subr.bf16.mxu1 %v2229_v0 }
 0x48c   :  { %1907 = vmatpush3.bf16.msra.mxu1 %v2315_v7 }
 0x48d   :  { %1908 = vmatprep.subr.bf16.mxu1 %v2229_v0 }
 0x490   :  { %1909 = vmatpush3.bf16.msra.mxu1 %v2330_v9 }
 0x491   :  { %1910 = vmatprep.subr.bf16.mxu1 %v2229_v0 }
 0x494   :  { %1911 = vmatpush3.bf16.msra.mxu1 %v2343_v11 }
 0x495   :  { %1912 = vmatprep.subr.bf16.mxu1 %v2229_v0 }
 0x498   :  { %1913 = vmatpush3.bf16.msra.mxu1 %v2360_v13 }
 0x499   :  { %1914 = vmatprep.subr.bf16.mxu1 %v2229_v0 }
 0x49c   :  { %1915 = vmatpush3.bf16.msra.mxu1 %v2374_v15 }
 0x49d   :  { %1916 = vmatprep.subr.bf16.mxu1 %v2229_v0 }
 0x4a0   :  { %1917 = vmatpush3.bf16.msra.mxu1 %v2386_v17 }
 0x4a1   :  { %1918 = vmatprep.subr.bf16.mxu1 %v2229_v0 }
 0x4a4   :  { %1919 = vmatpush3.bf16.msra.mxu1 %v2400_v19 }
 0x4a5   :  { %1924 = vmatprep.subr.bf16.mxu1 %v2229_v0 }
 0x4a7   :  { %1921 = vmatmul.mubr.bf16.vlgmr.msra.gmra.mrb[20].mxu1 %v777_v61 }
 0x4a8   :  { %1925 = vmatpush3.bf16.msra.mxu1 %v2454_v40  ;;  %1940 = vmatprep.mubr.msk.bf16.mxu1 %vm2230_vm0, %v2229_v0 }
 0x4a9   :  { %1926 = vmatprep.subr.bf16.mxu1 %v2229_v0 }
 0x4ac   :  { %1927 = vmatpush3.bf16.msra.mxu1 %v2460_v42 }
 0x4ad   :  { %1928 = vmatprep.subr.bf16.mxu1 %v2229_v0 }
 0x4b0   :  { %1929 = vmatpush3.bf16.msra.mxu1 %v2473_v43 }
 0x4b1   :  { %1930 = vmatprep.subr.bf16.mxu1 %v2229_v0 }
 0x4b3   :  { %v767_v62 = vpop.f32.mrb[16].mxu0 }
 0x4b4   :  { %v2126_v63 = vadd.f32 %v767_v62, %v2487_v45  ;;  %v1882_v1 = vpop.f32.mrb[17].mxu0  ;;  %1931 = vmatpush3.bf16.msra.mxu1 %v2482_v44 }
 0x4b5   :  { %v770_v2 = vpop.f32.mrb[18].mxu0  ;;  %1932 = vmatprep.subr.bf16.mxu1 %v2229_v0 }
 0x4b6   :  { %2210 = vtanh.f32 %v2126_v63  ;;  %v1883_v3 = vpop.f32.mrb[19].mxu0 }
 0x4b8   :  { %1933 = vmatpush3.bf16.msra.mxu1 %v2497_v47 }
 0x4b9   :  { %1934 = vmatprep.subr.bf16.mxu1 %v2229_v0 }
 0x4bc   :  { %1935 = vmatpush3.bf16.msra.mxu1 %v2506_v48 }
 0x4bd   :  { %1936 = vmatprep.subr.bf16.mxu1 %v2229_v0 }
 0x4c0   :  { %v2211_v20 = vpop.eup %2210  ;;  %1937 = vmatpush3.bf16.msra.mxu1 %v2515_v49 }
 0x4c1   :  { %v1268_v21 = vrot.slane %v2211_v20, 5  ;;  %1938 = vmatprep.subr.bf16.mxu1 %v2229_v0  ;;  %v775_v24 = vpack.c.bf16 %v2211_v20, %v2211_v20 }
 0x4c3   :  { %v2712_v23 = vsel %vm1286_vm4, %v2652_v52, %v1268_v21  ;;  %v2226_v52 = vld [vmem:[%s2900_s4] sm:$0xff]  }
 0x4c4   :  { %1939 = vmatpush3.bf16.msra.mxu1 %v2524_v50 }
 0x4c5   :  { %2004 = vmatprep.subr.bf16.mxu1 %v2229_v0 }
 0x4c7   :  { %1941 = vmatmul.mubr.bf16.vlgmr.msra.gmra.mrb[20].mxu1 %v775_v24 }
 0x4c8   :  { %2005 = vmatpush3.bf16.msra.mxu1 %v2296_v4  ;;  %2020 = vmatprep.mubr.msk.bf16.mxu1 %vm2230_vm0, %v2229_v0 }
 0x4c9   :  { %2006 = vmatprep.subr.bf16.mxu1 %v2229_v0 }
 0x4cc   :  { %2007 = vmatpush3.bf16.msra.mxu1 %v2308_v6 }
 0x4cd   :  { %2008 = vmatprep.subr.bf16.mxu1 %v2229_v0 }
 0x4d0   :  { %2009 = vmatpush3.bf16.msra.mxu1 %v2324_v8 }
 0x4d1   :  { %2010 = vmatprep.subr.bf16.mxu1 %v2229_v0 }
 0x4d4   :  { %2011 = vmatpush3.bf16.msra.mxu1 %v2336_v10 }
 0x4d5   :  { %2012 = vmatprep.subr.bf16.mxu1 %v2229_v0 }
 0x4d8   :  { %2013 = vmatpush3.bf16.msra.mxu1 %v2355_v12 }
 0x4d9   :  { %2014 = vmatprep.subr.bf16.mxu1 %v2229_v0 }
 0x4dc   :  { %2015 = vmatpush3.bf16.msra.mxu1 %v2369_v14 }
 0x4dd   :  { %2016 = vmatprep.subr.bf16.mxu1 %v2229_v0 }
 0x4e0   :  { %2017 = vmatpush3.bf16.msra.mxu1 %v2381_v16 }
 0x4e1   :  { %2018 = vmatprep.subr.bf16.mxu1 %v2229_v0 }
 0x4e4   :  { %2019 = vmatpush3.bf16.msra.mxu1 %v2395_v18 }
 0x4e5   :  { %2024 = vmatprep.subr.bf16.mxu1 %v2229_v0 }
 0x55a   :  { %v813_v4 = vpop.f32.mrb[16].mxu1 }
 0x55b   :  { %v820_v6 = vrot.slane %v813_v4, 3  ;;  %v1902_v8 = vpop.f32.mrb[17].mxu1 }
 0x55c   :  { %v816_v10 = vpop.f32.mrb[18].mxu1  ;;  %v2191_v8 = vld [vmem:[%s2904_s7 + $0x28] sm:$0xff]  }
 0x55d   :  { %v822_v12 = vadd.f32 %v820_v6, %v2411_v22  ;;  %v1903_v25 = vpop.f32.mrb[19].mxu1  ;;  %v2192_v10 = vld [vmem:[%s2904_s7 + $0x30] sm:$0xff]  }
 0x55f   :  { %2212 = vtanh.f32 %v822_v12  ;;  %v2193_v12 = vld [vmem:[%s2904_s7 + $0x38] sm:$0xff]  }
 0x569   :  { %v2213_v26 = vpop.eup %2212 }
 0x56a   :  { %v824_v14 = vpack.c.bf16 %v2213_v26, %v2213_v26 }
 0x56c   :  { %v909_v27 = vshrl.u32 %v824_v14, 16 }
 0x56e   :  { %v911_v28 = vrot.slane %v909_v27, 2 }
 0x570   :  { %1961 = vmatmul.mubr.bf16.vlgmr.msra.gmra.mrb[20].mxu0 %v911_v28 }
 0x571   :  { %1965 = vmatpush3.bf16.msra.mxu0 %v2302_v5  ;;  %1980 = vmatprep.mubr.msk.bf16.mxu0 %vm2230_vm0, %v2229_v0 }
 0x572   :  { %1966 = vmatprep.subr.bf16.mxu0 %v2229_v0 }
 0x575   :  { %1967 = vmatpush3.bf16.msra.mxu0 %v2315_v7 }
 0x576   :  { %1968 = vmatprep.subr.bf16.mxu0 %v2229_v0 }
 0x579   :  { %1969 = vmatpush3.bf16.msra.mxu0 %v2330_v9 }
 0x57a   :  { %1970 = vmatprep.subr.bf16.mxu0 %v2229_v0 }
 0x57d   :  { %1971 = vmatpush3.bf16.msra.mxu0 %v2343_v11 }
 0x57e   :  { %1972 = vmatprep.subr.bf16.mxu0 %v2229_v0 }
 0x581   :  { %1973 = vmatpush3.bf16.msra.mxu0 %v2360_v13 }
 0x582   :  { %1974 = vmatprep.subr.bf16.mxu0 %v2229_v0 }
 0x585   :  { %1975 = vmatpush3.bf16.msra.mxu0 %v2374_v15 }
 0x586   :  { %1976 = vmatprep.subr.bf16.mxu0 %v2229_v0 }
 0x589   :  { %1977 = vmatpush3.bf16.msra.mxu0 %v2386_v17 }
 0x58a   :  { %1978 = vmatprep.subr.bf16.mxu0 %v2229_v0 }
 0x58d   :  { %1979 = vmatpush3.bf16.msra.mxu0 %v2400_v19 }
 0x58e   :  { %1984 = vmatprep.subr.bf16.mxu0 %v2229_v0 }
 0x590   :  { %1981 = vmatmul.mubr.bf16.vlgmr.msra.gmra.mrb[24].mxu0 %v911_v28 }
 0x591   :  { %1985 = vmatpush3.bf16.msra.mxu0 %v2454_v40  ;;  %2000 = vmatprep.mubr.msk.bf16.mxu0 %vm2230_vm0, %v2229_v0 }
 0x592   :  { %1986 = vmatprep.subr.bf16.mxu0 %v2229_v0 }
 0x595   :  { %1987 = vmatpush3.bf16.msra.mxu0 %v2460_v42 }
 0x596   :  { %1988 = vmatprep.subr.bf16.mxu0 %v2229_v0 }
 0x599   :  { %1989 = vmatpush3.bf16.msra.mxu0 %v2473_v43 }
 0x59a   :  { %v899_v16 = vpop.f32.mrb[20].mxu1  ;;  %1990 = vmatprep.subr.bf16.mxu0 %v2229_v0 }
 0x59b   :  { %v2127_v18 = vadd.f32 %v899_v16, %v2487_v45  ;;  %v1942_v29 = vpop.f32.mrb[21].mxu1 }
 0x59c   :  { %v902_v30 = vpop.f32.mrb[22].mxu1 }
 0x59d   :  { %2214 = vtanh.f32 %v2127_v18  ;;  %v1943_v31 = vpop.f32.mrb[23].mxu1  ;;  %1991 = vmatpush3.bf16.msra.mxu0 %v2482_v44 }
 0x59e   :  { %1992 = vmatprep.subr.bf16.mxu0 %v2229_v0 }
 0x5a1   :  { %1993 = vmatpush3.bf16.msra.mxu0 %v2497_v47 }
 0x5a2   :  { %1994 = vmatprep.subr.bf16.mxu0 %v2229_v0 }
 0x5a5   :  { %1995 = vmatpush3.bf16.msra.mxu0 %v2506_v48 }
 0x5a6   :  { %1996 = vmatprep.subr.bf16.mxu0 %v2229_v0 }
 0x5a7   :  { %v2215_v32 = vpop.eup %2214 }
 0x5a8   :  { %v1271_v33 = vrot.slane %v2215_v32, 4  ;;  %v907_v35 = vpack.c.bf16 %v2215_v32, %v2215_v32 }
 0x5a9   :  { %1997 = vmatpush3.bf16.msra.mxu0 %v2515_v49 }
 0x5aa   :  { %1998 = vmatprep.subr.bf16.mxu0 %v2229_v0  ;;  %v2771_v34 = vsel %vm1288_vm5, %v2712_v23, %v1271_v33 }
 0x5ad   :  { %1999 = vmatpush3.bf16.msra.mxu0 %v2524_v50 }
 0x5ae   :  { %2064 = vmatprep.subr.bf16.mxu0 %v2229_v0 }
 0x5b0   :  { %2001 = vmatmul.mubr.bf16.vlgmr.msra.gmra.mrb[24].mxu0 %v907_v35 }
 0x5b1   :  { %2065 = vmatpush3.bf16.msra.mxu0 %v2302_v5  ;;  %2080 = vmatprep.mubr.msk.bf16.mxu0 %vm2230_vm0, %v2229_v0 }
 0x5b2   :  { %2066 = vmatprep.subr.bf16.mxu0 %v2229_v0 }
 0x5b5   :  { %2067 = vmatpush3.bf16.msra.mxu0 %v2315_v7 }
 0x5b6   :  { %2068 = vmatprep.subr.bf16.mxu0 %v2229_v0 }
 0x5b9   :  { %2069 = vmatpush3.bf16.msra.mxu0 %v2330_v9 }
 0x5ba   :  { %2070 = vmatprep.subr.bf16.mxu0 %v2229_v0 }
 0x5bd   :  { %2071 = vmatpush3.bf16.msra.mxu0 %v2343_v11 }
 0x5be   :  { %2072 = vmatprep.subr.bf16.mxu0 %v2229_v0 }
 0x5c1   :  { %2073 = vmatpush3.bf16.msra.mxu0 %v2360_v13 }
 0x5c2   :  { %2074 = vmatprep.subr.bf16.mxu0 %v2229_v0 }
 0x5c5   :  { %2075 = vmatpush3.bf16.msra.mxu0 %v2374_v15 }
 0x5c6   :  { %2076 = vmatprep.subr.bf16.mxu0 %v2229_v0 }
 0x5c9   :  { %2077 = vmatpush3.bf16.msra.mxu0 %v2386_v17 }
 0x5ca   :  { %2078 = vmatprep.subr.bf16.mxu0 %v2229_v0 }
 0x5cd   :  { %2079 = vmatpush3.bf16.msra.mxu0 %v2400_v19 }
 0x5ce   :  { %2084 = vmatprep.subr.bf16.mxu0 %v2229_v0 }
 0x643   :  { %v947_v5 = vpop.f32.mrb[20].mxu0 }
 0x644   :  { %v954_v7 = vrot.slane %v947_v5, 2  ;;  %v1962_v9 = vpop.f32.mrb[21].mxu0 }
 0x645   :  { %v950_v36 = vpop.f32.mrb[22].mxu0 }
 0x646   :  { %v956_v37 = vadd.f32 %v954_v7, %v2411_v22  ;;  %v1963_v38 = vpop.f32.mrb[23].mxu0 }
 0x648   :  { %2216 = vtanh.f32 %v956_v37 }
 0x652   :  { %v2217_v39 = vpop.eup %2216 }
 0x653   :  { %v958_v41 = vpack.c.bf16 %v2217_v39, %v2217_v39 }
 0x655   :  { %v1043_v46 = vrot.slane %v958_v41, 3 }
 0x657   :  { %2021 = vmatmul.mubr.bf16.vlgmr.msra.gmra.mrb[24].mxu1 %v1043_v46 }
 0x658   :  { %2025 = vmatpush3.bf16.msra.mxu1 %v2226_v52  ;;  %2040 = vmatprep.mubr.msk.bf16.mxu1 %vm2230_vm0, %v2229_v0 }
 0x659   :  { %2026 = vmatprep.subr.bf16.mxu1 %v2229_v0 }
 0x65c   :  { %2027 = vmatpush3.bf16.msra.mxu1 %v2227_v53 }
 0x65d   :  { %2028 = vmatprep.subr.bf16.mxu1 %v2229_v0 }
 0x660   :  { %2029 = vmatpush3.bf16.msra.mxu1 %v2228_v51 }
 0x661   :  { %2030 = vmatprep.subr.bf16.mxu1 %v2229_v0 }
 0x664   :  { %2031 = vmatpush3.bf16.msra.mxu1 %v2343_v11 }
 0x665   :  { %2032 = vmatprep.subr.bf16.mxu1 %v2229_v0 }
 0x668   :  { %2033 = vmatpush3.bf16.msra.mxu1 %v2360_v13 }
 0x669   :  { %2034 = vmatprep.subr.bf16.mxu1 %v2229_v0 }
 0x66c   :  { %2035 = vmatpush3.bf16.msra.mxu1 %v2374_v15 }
 0x66d   :  { %2036 = vmatprep.subr.bf16.mxu1 %v2229_v0 }
 0x670   :  { %2037 = vmatpush3.bf16.msra.mxu1 %v2386_v17 }
 0x671   :  { %2038 = vmatprep.subr.bf16.mxu1 %v2229_v0 }
 0x674   :  { %2039 = vmatpush3.bf16.msra.mxu1 %v2400_v19 }
 0x675   :  { %2044 = vmatprep.subr.bf16.mxu1 %v2229_v0 }
 0x677   :  { %2041 = vmatmul.mubr.bf16.vlgmr.msra.gmra.mrb[28].mxu1 %v1043_v46 }
 0x678   :  { %2045 = vmatpush3.bf16.msra.mxu1 %v2454_v40  ;;  %2060 = vmatprep.mubr.msk.bf16.mxu1 %vm2230_vm0, %v2229_v0 }
 0x679   :  { %2046 = vmatprep.subr.bf16.mxu1 %v2229_v0 }
 0x67c   :  { %2047 = vmatpush3.bf16.msra.mxu1 %v2460_v42 }
 0x67d   :  { %2048 = vmatprep.subr.bf16.mxu1 %v2229_v0 }
 0x680   :  { %2049 = vmatpush3.bf16.msra.mxu1 %v2473_v43 }
 0x681   :  { %2050 = vmatprep.subr.bf16.mxu1 %v2229_v0 }
 0x683   :  { %v1033_v11 = vpop.f32.mrb[24].mxu0 }
 0x684   :  { %v2128_v13 = vadd.f32 %v1033_v11, %v2487_v45  ;;  %v2002_v15 = vpop.f32.mrb[25].mxu0  ;;  %2051 = vmatpush3.bf16.msra.mxu1 %v2482_v44 }
 0x685   :  { %v1036_v17 = vpop.f32.mrb[26].mxu0  ;;  %2052 = vmatprep.subr.bf16.mxu1 %v2229_v0 }
 0x686   :  { %2218 = vtanh.f32 %v2128_v13  ;;  %v2003_v19 = vpop.f32.mrb[27].mxu0 }
 0x688   :  { %2053 = vmatpush3.bf16.msra.mxu1 %v2497_v47 }
 0x689   :  { %2054 = vmatprep.subr.bf16.mxu1 %v2229_v0 }
 0x68c   :  { %2055 = vmatpush3.bf16.msra.mxu1 %v2506_v48 }
 0x68d   :  { %2056 = vmatprep.subr.bf16.mxu1 %v2229_v0 }
 0x690   :  { %v2219_v54 = vpop.eup %2218  ;;  %2057 = vmatpush3.bf16.msra.mxu1 %v2515_v49 }
 0x691   :  { %v1274_v55 = vrot.slane %v2219_v54, 3  ;;  %2058 = vmatprep.subr.bf16.mxu1 %v2229_v0  ;;  %v1041_v57 = vpack.c.bf16 %v2219_v54, %v2219_v54 }
 0x693   :  { %v1291_v56 = vsel %vm1290_vm6, %v2771_v34, %v1274_v55 }
 0x694   :  { %2059 = vmatpush3.bf16.msra.mxu1 %v2524_v50 }
 0x695   :  { %2104 = vmatprep.subr.bf16.mxu1 %v2229_v0 }
 0x697   :  { %2061 = vmatmul.mubr.bf16.vlgmr.msra.gmra.mrb[28].mxu1 %v1041_v57 }
 0x698   :  { %2120 = vmatprep.mubr.msk.bf16.mxu1 %vm2230_vm0, %v2229_v0  ;;  %2105 = vmatpush3.bf16.msra.mxu1 %v2186_v58 }
 0x699   :  { %2106 = vmatprep.subr.bf16.mxu1 %v2229_v0 }
 0x69c   :  { %2107 = vmatpush3.bf16.msra.mxu1 %v2187_v59 }
 0x69d   :  { %2108 = vmatprep.subr.bf16.mxu1 %v2229_v0 }
 0x6a0   :  { %2109 = vmatpush3.bf16.msra.mxu1 %v2188_v60 }
 0x6a1   :  { %2110 = vmatprep.subr.bf16.mxu1 %v2229_v0 }
 0x72a   :  { %v1079_v61 = vpop.f32.mrb[24].mxu1 }
 0x72b   :  { %v1086_v62 = vrot.slane %v1079_v61, 1  ;;  %v2022_v63 = vpop.f32.mrb[25].mxu1 }
 0x72c   :  { %v1082_v1 = vpop.f32.mrb[26].mxu1 }
 0x72d   :  { %v1088_v2 = vadd.f32 %v1086_v62, %v2411_v22  ;;  %v2023_v3 = vpop.f32.mrb[27].mxu1 }
 0x72f   :  { %2220 = vtanh.f32 %v1088_v2 }
 0x739   :  { %v2221_v20 = vpop.eup %2220 }
 0x73a   :  { %v1090_v21 = vpack.c.bf16 %v2221_v20, %v2221_v20 }
 0x73c   :  { %v1175_v23 = vshrl.u32 %v1090_v21, 16 }
 0x73e   :  { %v1177_v24 = vrot.slane %v1175_v23, 3 }
 0x740   :  { %2081 = vmatmul.mubr.bf16.vlgmr.msra.gmra.mrb[28].mxu0 %v1177_v24 }
 0x741   :  { %2085 = vmatpush3.bf16.msra.mxu0 %v2454_v40  ;;  %2100 = vmatprep.mubr.msk.bf16.mxu0 %vm2230_vm0, %v2229_v0 }
 0x742   :  { %2086 = vmatprep.subr.bf16.mxu0 %v2229_v0 }
 0x745   :  { %2087 = vmatpush3.bf16.msra.mxu0 %v2460_v42 }
 0x746   :  { %2088 = vmatprep.subr.bf16.mxu0 %v2229_v0 }
 0x749   :  { %2089 = vmatpush3.bf16.msra.mxu0 %v2473_v43 }
 0x74a   :  { %2090 = vmatprep.subr.bf16.mxu0 %v2229_v0 }
 0x74d   :  { %2091 = vmatpush3.bf16.msra.mxu0 %v2482_v44 }
 0x74e   :  { %2092 = vmatprep.subr.bf16.mxu0 %v2229_v0 }
 0x751   :  { %2093 = vmatpush3.bf16.msra.mxu0 %v2497_v47 }
 0x752   :  { %2094 = vmatprep.subr.bf16.mxu0 %v2229_v0 }
 0x755   :  { %2095 = vmatpush3.bf16.msra.mxu0 %v2506_v48 }
 0x756   :  { %2096 = vmatprep.subr.bf16.mxu0 %v2229_v0 }
 0x759   :  { %2097 = vmatpush3.bf16.msra.mxu0 %v2515_v49  ;;  %v2189_v49 = vld [vmem:[%s2904_s7 + $0x18] sm:$0xff]  }
 0x75a   :  { %2098 = vmatprep.subr.bf16.mxu0 %v2229_v0  ;;  %2111 = vmatpush3.bf16.msra.mxu1 %v2189_v49 }
 0x75b   :  { %2112 = vmatprep.subr.bf16.mxu1 %v2229_v0 }
 0x75d   :  { %2099 = vmatpush3.bf16.msra.mxu0 %v2524_v50  ;;  %v2190_v50 = vld [vmem:[%s2904_s7 + $0x20] sm:$0xff]  }
 0x75e   :  { %2113 = vmatpush3.bf16.msra.mxu1 %v2190_v50 }
 0x75f   :  { %2114 = vmatprep.subr.bf16.mxu1 %v2229_v0 }
 0x762   :  { %2115 = vmatpush3.bf16.msra.mxu1 %v2191_v8 }
 0x763   :  { %2116 = vmatprep.subr.bf16.mxu1 %v2229_v0 }
 0x766   :  { %2117 = vmatpush3.bf16.msra.mxu1 %v2192_v10 }
 0x767   :  { %2118 = vmatprep.subr.bf16.mxu1 %v2229_v0  ;;  %v1440_v0 = vld [vmem:[%s2905_s8] ss:$0 sm:$0xff] }
 0x76a   :  { %v1165_v22 = vpop.f32.mrb[28].mxu1  ;;  %2119 = vmatpush3.bf16.msra.mxu1 %v2193_v12 }
 0x76b   :  { %v2129_v40 = vadd.f32 %v1165_v22, %v2487_v45  ;;  %v2062_v42 = vpop.f32.mrb[29].mxu1 }
 0x76c   :  { %v1168_v43 = vpop.f32.mrb[30].mxu1 }
 0x76d   :  { %2222 = vtanh.f32 %v2129_v40  ;;  %v2063_v44 = vpop.f32.mrb[31].mxu1 }
 0x777   :  { %v2223_v47 = vpop.eup %2222 }
 0x778   :  { %v1277_v4 = vrot.slane %v2223_v47, 2  ;;  %v1173_v6 = vpack.c.bf16 %v2223_v47, %v2223_v47 }
 0x77a   :  { %2101 = vmatmul.mubr.bf16.vlgmr.msra.gmra.mrb[28].mxu0 %v1173_v6  ;;  %v1293_v48 = vsel %vm1292_vm7, %v1291_v56, %v1277_v4 }
 0x84d   :  { %v1253_v25 = vpop.f32.mrb[28].mxu0 }
 0x84e   :  { %v2130_v26 = vadd.f32 %v1253_v25, %v2487_v45  ;;  %v2102_v14 = vpop.f32.mrb[29].mxu0 }
 0x84f   :  { %v1256_v27 = vpop.f32.mrb[30].mxu0 }
 0x850   :  { %2224 = vtanh.f32 %v2130_v26  ;;  %v2103_v28 = vpop.f32.mrb[31].mxu0 }
 0x85a   :  { %v2225_v16 = vpop.eup %2224 }
 0x85b   :  { %v1280_v18 = vrot.slane %v2225_v16, 1 }
 0x85d   :  { %v1295_v29 = vsel %vm1294_vm8, %v1293_v48, %v1280_v18 }
 0x85e   :  { %v1296_v30 = vpack.c.bf16 %v1295_v29, %v1295_v29 }
 0x860   :  { %2121 = vmatmul.mubr.bf16.vlgmr.msra.gmra.mrb[32].mxu1 %v1296_v30 }
 0x933   :  { %v1402_v31 = vpop.f32.mrb[32].mxu1 }
 0x934   :  { %v1403_v32 = vadd.f32 %v1440_v0, %v1402_v31  ;;  %v2122_v33 = vpop.f32.mrb[33].mxu1 }
 0x935   :  { %v1405_v34 = vpop.f32.mrb[34].mxu1 }
 0x936   :  { %1408 = vst [vmem:[%s2906_s9] sm:$0xff] %v1403_v32  ;;  %v2123_v45 = vpop.f32.mrb[35].mxu1 }

</bundles_post_ra>
